<compile_context>
chip_gen: v7x
topology: tpu7x:2x2x1
jax: 0.10.0
libtpu: 0.0.40
codegen_flags: <defaults>
</compile_context>

<pallas_src>
import jax
import jax.numpy as jnp
from jax.experimental import pallas as pl
from jax.experimental.pallas import tpu as pltpu


def _metaphor_kernel_lane_dense(x_ref, w_ref, b_ref, o_ref):
    # Linear: [TM, F] @ [F, C] + [1, C] -> logits [TM, C]  (MXU, f32 accum).
    logits = jnp.dot(x_ref[...], w_ref[...],
                     preferred_element_type=jnp.float32) + b_ref[...]
    # Numerically stable log_softmax over the class axis.
    m = jnp.max(logits, axis=-1, keepdims=True)
    shifted = logits - m
    lse = jnp.log(jnp.sum(jnp.exp(shifted), axis=-1, keepdims=True))
    logp = shifted - lse                                   # [TM, C]
    # Lane-dense store: [C, TM] puts the long axis on the 128-lane dim, so the
    # writeback uses unmasked full-lane stores / long contiguous DMA rows and
    # the out VMEM tile is ~32x smaller than the lane-padded [TM, 4] layout.
    # The transpose is tiny (TM*C elements) and runs on the XLU, off the
    # VALU/MXU critical path.
    o_ref[...] = logp.T.astype(o_ref.dtype)


def _metaphor_kernel_row_major(x_ref, w_ref, b_ref, o_ref):
    # Fallback layout: stores [TM, C] directly (masked 4/128-lane stores).
    logits = jnp.dot(x_ref[...], w_ref[...],
                     preferred_element_type=jnp.float32) + b_ref[...]
    m = jnp.max(logits, axis=-1, keepdims=True)
    shifted = logits - m
    lse = jnp.log(jnp.sum(jnp.exp(shifted), axis=-1, keepdims=True))
    o_ref[...] = (shifted - lse).astype(o_ref.dtype)


def _round_up(v, m):
    return ((v + m - 1) // m) * m


def _build_call(M, feat, num_classes, block_m, lane_dense):
    grid = (pl.cdiv(M, block_m),)
    itemsize = 4  # f32
    cost = pl.CostEstimate(
        flops=2 * M * feat * num_classes,
        transcendentals=M * num_classes + M,   # exp per logit + log per row
        bytes_accessed=(M * feat * itemsize
                        + feat * num_classes * itemsize
                        + num_classes * itemsize
                        + M * num_classes * itemsize),
    )
    in_specs = [
        pl.BlockSpec((block_m, feat), lambda i: (i, 0)),        # x: streamed
        pl.BlockSpec((feat, num_classes), lambda i: (0, 0)),    # W: resident
        pl.BlockSpec((1, num_classes), lambda i: (0, 0)),       # b: resident
    ]
    if lane_dense:
        kernel = _metaphor_kernel_lane_dense
        out_shape = jax.ShapeDtypeStruct((num_classes, M), jnp.float32)
        out_spec = pl.BlockSpec((num_classes, block_m), lambda i: (0, i))
    else:
        kernel = _metaphor_kernel_row_major
        out_shape = jax.ShapeDtypeStruct((M, num_classes), jnp.float32)
        out_spec = pl.BlockSpec((block_m, num_classes), lambda i: (i, 0))
    return pl.pallas_call(
        kernel,
        out_shape=out_shape,
        grid=grid,
        in_specs=in_specs,
        out_specs=out_spec,
        compiler_params=pltpu.CompilerParams(
            dimension_semantics=("parallel",),     # shard rows across TCs (v7x)
            vmem_limit_bytes=32 * 1024 * 1024,     # headroom on v5e's 16 MiB default
        ),
        cost_estimate=cost,
    )


def metaphor_forward(x, weight_t, bias, *, tm=8192):
    """Fused Linear + log_softmax (eval-mode Metaphor forward).

    x:        [..., F]  with F = hidden_dim * 2
    weight_t: [F, C]    (PyTorch weight [C, F] transposed ONCE at init)
    bias:     [C]
    returns:  [..., C]  log-probabilities (float32)
    """
    *lead, feat = x.shape
    num_classes = weight_t.shape[1]
    x2d = x.reshape(-1, feat)                    # [M, F]; features on lanes
    b2d = bias.reshape(1, num_classes)           # [1, C]
    M = x2d.shape[0]

    tm = max(128, (int(tm) // 128) * 128)        # keep the row tile 128-aligned
    if M <= 256:
        # Single block: trivially satisfies the (8,128)/full-extent rule and
        # splitting across TensorCores is pointless at this size.
        block_m = M
    else:
        # Cap the tile so the grid has >= 2 steps (v7x megacore split) and keep
        # it a multiple of 128 so the lane-dense out block stays legal even
        # with a ragged tail.
        block_m = min(tm, _round_up(pl.cdiv(M, 2), 128))

    # Called eagerly, so Mosaic lowering/compile errors surface here and the
    # row-major fallback can take over; under jit the lane-dense path is used.
    try:
        out_t = _build_call(M, feat, num_classes, block_m, lane_dense=True)(
            x2d, weight_t, b2d)
        out = out_t.T                            # tiny [C, M] -> [M, C]
    except Exception:
        out = _build_call(M, feat, num_classes, block_m, lane_dense=False)(
            x2d, weight_t, b2d)

    return out.reshape(*lead, num_classes)


if __name__ == "__main__":
    # Small shapes consistent with the module:
    #   hidden_dim = 16 -> input feature size = hidden_dim * 2 = 32
    #   num_classes = 4, batch = 2, seq = 8
    hidden_dim = 16
    num_classes = 4
    batch, seq = 2, 8
    feat = hidden_dim * 2

    key = jax.random.PRNGKey(0)
    kx, kw, kb = jax.random.split(key, 3)

    x = jax.random.normal(kx, (batch, seq, feat), dtype=jnp.float32)
    # Deterministic parameter init (Linear: weight [C, F], bias [C]),
    # matching PyTorch's U(-1/sqrt(F), 1/sqrt(F)) style bound.
    bound = 1.0 / jnp.sqrt(jnp.float32(feat))
    weight = jax.random.uniform(kw, (num_classes, feat), jnp.float32,
                                minval=-bound, maxval=bound)
    bias = jax.random.uniform(kb, (num_classes,), jnp.float32,
                              minval=-bound, maxval=bound)

    # Hoist the transpose out of the per-call path (store W as [F, C] once).
    weight_t = jnp.asarray(weight.T)

    # --- primary run at the module's small shapes (single-block path) ---
    out = metaphor_forward(x, weight_t, bias)
    jax.block_until_ready(out)

    ref = jax.nn.log_softmax(x @ weight.T + bias, axis=-1)
    assert out.shape == (batch, seq, num_classes)
    # Tolerance allows for reduced-precision f32 MXU passes on some generations.
    assert jnp.allclose(out, ref, atol=2e-3, rtol=2e-3), \
        float(jnp.max(jnp.abs(out - ref)))

    # --- exercise the tiled/grid path: M=300 -> block_m=256, 2 grid steps
    #     (v7x TC split) with a ragged tail block ---
    batch2, seq2 = 3, 100
    x2 = jax.random.normal(jax.random.PRNGKey(1), (batch2, seq2, feat),
                           dtype=jnp.float32)
    out2 = metaphor_forward(x2, weight_t, bias)
    jax.block_until_ready(out2)
    ref2 = jax.nn.log_softmax(x2 @ weight.T + bias, axis=-1)
    assert out2.shape == (batch2, seq2, num_classes)
    assert jnp.allclose(out2, ref2, atol=2e-3, rtol=2e-3), \
        float(jnp.max(jnp.abs(out2 - ref2)))

    print("KERNEL_OK")
</pallas_src>

<mosaic_0001>
module attributes {stable_mosaic.version = 11 : i64} {
  func.func @_metaphor_kernel_lane_dense(%arg0: i32, %arg1: memref<16x32xf32, #tpu.memory_space<vmem>>, %arg2: memref<32x4xf32, #tpu.memory_space<vmem>>, %arg3: memref<1x4xf32, #tpu.memory_space<vmem>>, %arg4: memref<4x16xf32, #tpu.memory_space<vmem>>) attributes {dimension_semantics = [#tpu.dimension_semantics<parallel>], iteration_bounds = array<i64: 1>, scalar_prefetch = 0 : i64, scratch_operands = 0 : i64, tpu.core_type = #tpu.core_type<tc>, window_params = [{transform_indices = @transform_0, window_bounds = array<i64: 16, 32>}, {pipeline_mode = #tpu.pipeline_mode<synchronous>, transform_indices = @transform_1, window_bounds = array<i64: 32, 4>}, {pipeline_mode = #tpu.pipeline_mode<synchronous>, transform_indices = @transform_2, window_bounds = array<i64: 1, 4>}, {transform_indices = @transform_3, window_bounds = array<i64: 4, 16>}]} {
    %c0 = arith.constant 0 : index
    %c0_0 = arith.constant 0 : index
    %0 = vector.load %arg1[%c0, %c0_0] : memref<16x32xf32, #tpu.memory_space<vmem>>, vector<16x32xf32>
    %c0_1 = arith.constant 0 : index
    %c0_2 = arith.constant 0 : index
    %1 = vector.load %arg2[%c0_1, %c0_2] : memref<32x4xf32, #tpu.memory_space<vmem>>, vector<32x4xf32>
    %cst = arith.constant dense<0.000000e+00> : vector<16x4xf32>
    %2 = tpu.matmul %0, %1, %cst {dimension_numbers = #tpu.dot_dimension_numbers<[1], [0], [0], [1], [0, 0, 1, 1], [], []>} : vector<16x32xf32>, vector<32x4xf32>, vector<16x4xf32> -> vector<16x4xf32>
    %c0_3 = arith.constant 0 : index
    %c0_4 = arith.constant 0 : index
    %3 = vector.load %arg3[%c0_3, %c0_4] : memref<1x4xf32, #tpu.memory_space<vmem>>, vector<1x4xf32>
    %4 = vector.broadcast %3 : vector<1x4xf32> to vector<16x4xf32>
    %5 = arith.addf %2, %4 : vector<16x4xf32>
    %cst_5 = arith.constant dense<0xFF800000> : vector<16xf32>
    %6 = vector.multi_reduction <maximumf>, %5, %cst_5 [1] : vector<16x4xf32> to vector<16xf32>
    %7 = vector.shape_cast %6 : vector<16xf32> to vector<16x1xf32>
    %8 = vector.broadcast %7 : vector<16x1xf32> to vector<16x4xf32>
    %9 = arith.subf %5, %8 : vector<16x4xf32>
    %10 = math.exp %9 : vector<16x4xf32>
    %cst_6 = arith.constant dense<0.000000e+00> : vector<16xf32>
    %11 = vector.multi_reduction <add>, %10, %cst_6 [1] : vector<16x4xf32> to vector<16xf32>
    %12 = vector.shape_cast %11 : vector<16xf32> to vector<16x1xf32>
    %13 = math.log %12 : vector<16x1xf32>
    %14 = vector.broadcast %13 : vector<16x1xf32> to vector<16x4xf32>
    %15 = arith.subf %9, %14 : vector<16x4xf32>
    %16 = tpu.transpose %15, [1, 0] : vector<16x4xf32> -> vector<4x16xf32>
    %c0_7 = arith.constant 0 : index
    %c0_8 = arith.constant 0 : index
    %17 = vector.load %arg4[%c0_7, %c0_8] : memref<4x16xf32, #tpu.memory_space<vmem>>, vector<4x16xf32>
    tpu.vector_store %arg4[%c0_7, %c0_8], %16 {strides = array<i32>} : memref<4x16xf32, #tpu.memory_space<vmem>>, vector<4x16xf32>,
    return
  }
  func.func @transform_0(%arg0: i32) -> (i32, i32) {
    %c0_i32 = arith.constant 0 : i32
    %c0_i32_0 = arith.constant 0 : i32
    return %arg0, %c0_i32 : i32, i32
  }
  func.func @transform_1(%arg0: i32) -> (i32, i32) {
    %c0_i32 = arith.constant 0 : i32
    %c0_i32_0 = arith.constant 0 : i32
    %c0_i32_1 = arith.constant 0 : i32
    return %c0_i32, %c0_i32_0 : i32, i32
  }
  func.func @transform_2(%arg0: i32) -> (i32, i32) {
    %c0_i32 = arith.constant 0 : i32
    %c0_i32_0 = arith.constant 0 : i32
    %c0_i32_1 = arith.constant 0 : i32
    return %c0_i32, %c0_i32_0 : i32, i32
  }
  func.func @transform_3(%arg0: i32) -> (i32, i32) {
    %c0_i32 = arith.constant 0 : i32
    %c0_i32_0 = arith.constant 0 : i32
    return %c0_i32, %arg0 : i32, i32
  }
}

module attributes {stable_mosaic.version = 11 : i64} {
  func.func @_metaphor_kernel_row_major(%arg0: i32, %arg1: memref<16x32xf32, #tpu.memory_space<vmem>>, %arg2: memref<32x4xf32, #tpu.memory_space<vmem>>, %arg3: memref<1x4xf32, #tpu.memory_space<vmem>>, %arg4: memref<16x4xf32, #tpu.memory_space<vmem>>) attributes {dimension_semantics = [#tpu.dimension_semantics<parallel>], iteration_bounds = array<i64: 1>, scalar_prefetch = 0 : i64, scratch_operands = 0 : i64, tpu.core_type = #tpu.core_type<tc>, window_params = [{transform_indices = @transform_0, window_bounds = array<i64: 16, 32>}, {pipeline_mode = #tpu.pipeline_mode<synchronous>, transform_indices = @transform_1, window_bounds = array<i64: 32, 4>}, {pipeline_mode = #tpu.pipeline_mode<synchronous>, transform_indices = @transform_2, window_bounds = array<i64: 1, 4>}, {transform_indices = @transform_3, window_bounds = array<i64: 16, 4>}]} {
    %c0 = arith.constant 0 : index
    %c0_0 = arith.constant 0 : index
    %0 = vector.load %arg1[%c0, %c0_0] : memref<16x32xf32, #tpu.memory_space<vmem>>, vector<16x32xf32>
    %c0_1 = arith.constant 0 : index
    %c0_2 = arith.constant 0 : index
    %1 = vector.load %arg2[%c0_1, %c0_2] : memref<32x4xf32, #tpu.memory_space<vmem>>, vector<32x4xf32>
    %cst = arith.constant dense<0.000000e+00> : vector<16x4xf32>
    %2 = tpu.matmul %0, %1, %cst {dimension_numbers = #tpu.dot_dimension_numbers<[1], [0], [0], [1], [0, 0, 1, 1], [], []>} : vector<16x32xf32>, vector<32x4xf32>, vector<16x4xf32> -> vector<16x4xf32>
    %c0_3 = arith.constant 0 : index
    %c0_4 = arith.constant 0 : index
    %3 = vector.load %arg3[%c0_3, %c0_4] : memref<1x4xf32, #tpu.memory_space<vmem>>, vector<1x4xf32>
    %4 = vector.broadcast %3 : vector<1x4xf32> to vector<16x4xf32>
    %5 = arith.addf %2, %4 : vector<16x4xf32>
    %cst_5 = arith.constant dense<0xFF800000> : vector<16xf32>
    %6 = vector.multi_reduction <maximumf>, %5, %cst_5 [1] : vector<16x4xf32> to vector<16xf32>
    %7 = vector.shape_cast %6 : vector<16xf32> to vector<16x1xf32>
    %8 = vector.broadcast %7 : vector<16x1xf32> to vector<16x4xf32>
    %9 = arith.subf %5, %8 : vector<16x4xf32>
    %10 = math.exp %9 : vector<16x4xf32>
    %cst_6 = arith.constant dense<0.000000e+00> : vector<16xf32>
    %11 = vector.multi_reduction <add>, %10, %cst_6 [1] : vector<16x4xf32> to vector<16xf32>
    %12 = vector.shape_cast %11 : vector<16xf32> to vector<16x1xf32>
    %13 = math.log %12 : vector<16x1xf32>
    %14 = vector.broadcast %13 : vector<16x1xf32> to vector<16x4xf32>
    %15 = arith.subf %9, %14 : vector<16x4xf32>
    %c0_7 = arith.constant 0 : index
    %c0_8 = arith.constant 0 : index
    %16 = vector.load %arg4[%c0_7, %c0_8] : memref<16x4xf32, #tpu.memory_space<vmem>>, vector<16x4xf32>
    tpu.vector_store %arg4[%c0_7, %c0_8], %15 {strides = array<i32>} : memref<16x4xf32, #tpu.memory_space<vmem>>, vector<16x4xf32>,
    return
  }
  func.func @transform_0(%arg0: i32) -> (i32, i32) {
    %c0_i32 = arith.constant 0 : i32
    %c0_i32_0 = arith.constant 0 : i32
    return %arg0, %c0_i32 : i32, i32
  }
  func.func @transform_1(%arg0: i32) -> (i32, i32) {
    %c0_i32 = arith.constant 0 : i32
    %c0_i32_0 = arith.constant 0 : i32
    %c0_i32_1 = arith.constant 0 : i32
    return %c0_i32, %c0_i32_0 : i32, i32
  }
  func.func @transform_2(%arg0: i32) -> (i32, i32) {
    %c0_i32 = arith.constant 0 : i32
    %c0_i32_0 = arith.constant 0 : i32
    %c0_i32_1 = arith.constant 0 : i32
    return %c0_i32, %c0_i32_0 : i32, i32
  }
  func.func @transform_3(%arg0: i32) -> (i32, i32) {
    %c0_i32 = arith.constant 0 : i32
    %c0_i32_0 = arith.constant 0 : i32
    return %arg0, %c0_i32 : i32, i32
  }
}

</mosaic_0001>

<bundles_post_ra>
// kernel: tpu_custom_call.1
= control target key start
LH: loop header
LB: loop body
LE: loop exit
PB: predicated region body
PF: predicated region fallthrough
CT: control target
= control target key end

     0   :  { %vm28_vm0 = vcmask 261120   ;;  %s303_s0 = inlined_call_operand.vmem [shape: f32[16,32], index: 0, kind: input, shape index: {}]   ;;  %s304_s1 = inlined_call_operand.vmem [shape: f32[32,4], index: 1, kind: input, shape index: {}]   ;;  %s305_s2 = inlined_call_operand.vmem [shape: f32[1,4], index: 2, kind: input, shape index: {}]   ;;  %s306_s3 = inlined_call_operand.hbm [shape: f32[4,16], index: 3, kind: output, shape index: {}]  }
   0x1   :  { %v17_v0 = vld [vmem:[%s304_s1] sm:$0xff]  ;;  %v18_v1 = vld [vmem:[%s304_s1 + $0x8] sm:$0xff]  ;;  %v19_v2 = vld [vmem:[%s304_s1 + $0x10] sm:$0xff] }
   0x2   :  { %v203_v3 = vpack.c.bf16 %v18_v1, %v17_v0  ;;  %v20_v4 = vld [vmem:[%s304_s1 + $0x18] sm:$0xff]  ;;  %v15_v5 = vld [vmem:[%s303_s0] sm:$0xff] }
   0x3   :  { %v207_v6 = vpack.c.bf16 %v20_v4, %v19_v2  ;;  %200 = vmatprep.mubr.msk.f32.mxu0 %vm28_vm0, %v15_v5 }
   0x4   :  { %8 = vsyncpa [#allocation3], 0  ;;  %204 = vmatprep.subr.bf16.mxu0 %v203_v3  ;;  %v16_v7 = vld [vmem:[%s303_s0 + $0x8] sm:$0xff]  ;;  %v183_v8 = vld [vmem:[%s305_s2] ss:$0 sm:$0xff]  ;;  %vm110_vm1 = vcmask 31744  }
   0x5   :  { %206 = vmatpush3.bf16.msra.mxu0 %v203_v3  ;;  %s245_s0 = smov [#allocation2]   ;;  %vm167_vm2 = vcmask 125952  }
   0x6   :  { %208 = vmatprep.subr.bf16.mxu0 %v207_v6  ;;  %s175_s1 = sshll.u32 %s245_s0, 4  ;;  %s176_s1 = int_to_ptr.vmem [resolvable:$true] %s175_s1 }
   0x7   :  { %s221_s2 = scalar_lea.vmem %s176_s1, 64  ;;  %p226_p1 = scmp.lt.s32.totalorder %s176_s1, %s176_s1 }
   0x8   :  { %p222_p0 = scmp.ne.s32.totalorder %s176_s1, %s221_s2  ;;  %p227_p2 = scmp.lt.s32.totalorder %s221_s2, %s221_s2 }
   0x9   :  { %210 = vmatpush3.bf16.msra.mxu0 %v207_v6 }
   0xa   :  { %p228_p3 = por %p227_p2, %p226_p1 }
   0xc   :  { %201 = vmatmul.mubr.msk.f32.vlgmr.msra.gmra.mrb[0].mxu0 %vm28_vm0, %v16_v7  ;;  %p229_p4 = pnand %p228_p3, %p222_p0 }
  0xdf   :  { %v202_v9 = vpop.f32.mrb[0].mxu0 }
  0xe0   :  { %v101_v10 = vpop.f32.mrb[1].mxu0  ;;  %v107_v12 = vadd.f32 %v202_v9, %v183_v8 }
  0xe1   :  { %v102_v11 = vadd.f32 %v183_v8, %v101_v10 }
  0xe2   :  { %v114_v14 = vsel %vm110_vm1, %v107_v12, -inf }
  0xe3   :  { %v111_v13 = vsel %vm110_vm1, %v102_v11, -inf }
  0xe4   :  { %112 = vmax.xlane.f32.xlu0 %v111_v13 }
  0xe8   :  { %115 = vmax.xlane.f32.xlu0 %v114_v14 }
 0x171   :  { %v113_v15 = vpop.xlane.xlu0 %112 }
 0x172   :  { %v117_v16 = vsub.f32 %v102_v11, %v113_v15 }
 0x174   :  { %v119_v17 = vmul.f32 1.442695, %v117_v16 }
 0x175   :  { %v116_v18 = vpop.xlane.xlu0 %115 }
 0x176   :  { %213 = vpow2.f32 %v119_v17  ;;  %v118_v19 = vsub.f32 %v107_v12, %v116_v18 }
 0x178   :  { %v121_v20 = vmul.f32 1.442695, %v118_v19 }
 0x17a   :  { %215 = vpow2.f32 %v121_v20 }
 0x180   :  { %v214_v21 = vpop.eup %213 }
 0x181   :  { %v123_v22 = vsel %vm110_vm1, %v214_v21, 0.0 }
 0x182   :  { %124 = vadd.xlane.f32.xlu1 %v123_v22 }
 0x184   :  { %v216_v23 = vpop.eup %215 }
 0x185   :  { %v126_v24 = vsel %vm110_vm1, %v216_v23, 0.0 }
 0x186   :  { %127 = vadd.xlane.f32.xlu1 %v126_v24 }
 0x20f   :  { %v125_v25 = vpop.xlane.xlu1 %124 }
 0x210   :  { %217 = vlog2.f32 %v125_v25 }
 0x213   :  { %v128_v26 = vpop.xlane.xlu1 %127 }
 0x214   :  { %219 = vlog2.f32 %v128_v26 }
 0x21a   :  { %v218_v27 = vpop.eup %217 }
 0x21b   :  { %v130_v28 = vmul.f32 0.6931472, %v218_v27 }
 0x21d   :  { %v133_v29 = vsub.f32 %v117_v16, %v130_v28 }
 0x21e   :  { %v220_v30 = vpop.eup %219 }
 0x21f   :  { %v132_v31 = vmul.f32 0.6931472, %v220_v30  ;;  %135 = vxpose.xlu0.b32.start [1/2] (short) (narrow) %v133_v29, 8 }
 0x221   :  { %v134_v32 = vsub.f32 %v118_v19, %v132_v31 }
 0x223   :  { %136 = vxpose.xlu0.b32.end [2/2] (short) (narrow) %v134_v32, 8 }
 0x29f   :  { %v151_v33 = vpop.trf.xlu0 }
 0x2a0   :  { %168 = vst.msk [vmem:[#allocation2] sm:$0xf] %vm167_vm2, %v151_v33 }
 0x2a1   :  { %232 = shalt.err (!%p229_p4)
}
 0x2a2   :  { %s233_s28 = scalar_lea.hbm %s306_s3, 64 }
 0x2a3   :  { %p234_p5 = scmp.ne.s32.totalorder %s306_s3, %s233_s28  ;;  %p237_p6 = scmp.lt.u32.totalorder %s233_s28, %s306_s3 }
 0x2a5   :  { %p239_p7 = pnand %p237_p6, %p234_p5 }
 0x2a7   :  { %242 = shalt.err (!%p239_p7)
}
 0x2a8   :  { %178 = dma.vmem_to_hbm [thread:$0]  %s176_s1, 64, %s306_s3, [#allocation3]  }
 0x2a9   :  { %243 = dma.done.wait [#allocation3], 64  }
 0x2aa   :  { %244 = vsyncadd [#allocation3], 4294967232 }
 0x2ab   :  { %182 = vsyncpa [#allocation3], 1 }

// kernel: tpu_custom_call.1
= control target key start
LH: loop header
LB: loop body
LE: loop exit
PB: predicated region body
PF: predicated region fallthrough
CT: control target
= control target key end

     0   :  { %vm27_vm0 = vcmask 261120   ;;  %vm109_vm1 = vcmask 31744   ;;  %s229_s1 = inlined_call_operand.vmem [shape: f32[32,4], index: 1, kind: input, shape index: {}]   ;;  %s230_s0 = inlined_call_operand.vmem [shape: f32[16,32], index: 0, kind: input, shape index: {}]   ;;  %s231_s2 = inlined_call_operand.vmem [shape: f32[1,4], index: 2, kind: input, shape index: {}]   ;;  %s232_s3 = inlined_call_operand.vmem [shape: f32[16,4], index: 3, kind: output, shape index: {}]  }
   0x1   :  { %v16_v0 = vld [vmem:[%s229_s1] sm:$0xff]  ;;  %v17_v1 = vld [vmem:[%s229_s1 + $0x8] sm:$0xff]  ;;  %v18_v2 = vld [vmem:[%s229_s1 + $0x10] sm:$0xff] }
   0x2   :  { %v160_v3 = vpack.c.bf16 %v17_v1, %v16_v0  ;;  %v19_v4 = vld [vmem:[%s229_s1 + $0x18] sm:$0xff]  ;;  %v14_v5 = vld [vmem:[%s230_s0] sm:$0xff]  ;;  %v15_v7 = vld [vmem:[%s230_s0 + $0x8] sm:$0xff] }
   0x3   :  { %v164_v6 = vpack.c.bf16 %v19_v4, %v18_v2  ;;  %157 = vmatprep.mubr.msk.f32.mxu0 %vm27_vm0, %v14_v5  ;;  %v140_v8 = vld [vmem:[%s231_s2] ss:$0 sm:$0xff] }
   0x4   :  { %161 = vmatprep.subr.bf16.mxu0 %v160_v3 }
   0x5   :  { %163 = vmatpush3.bf16.msra.mxu0 %v160_v3 }
   0x6   :  { %165 = vmatprep.subr.bf16.mxu0 %v164_v6 }
   0x9   :  { %167 = vmatpush3.bf16.msra.mxu0 %v164_v6 }
   0xc   :  { %158 = vmatmul.mubr.msk.f32.vlgmr.msra.gmra.mrb[0].mxu0 %vm27_vm0, %v15_v7 }
  0xdf   :  { %v159_v9 = vpop.f32.mrb[0].mxu0 }
  0xe0   :  { %v100_v10 = vpop.f32.mrb[1].mxu0  ;;  %v106_v12 = vadd.f32 %v159_v9, %v140_v8 }
  0xe1   :  { %v101_v11 = vadd.f32 %v140_v8, %v100_v10 }
  0xe2   :  { %v113_v14 = vsel %vm109_vm1, %v106_v12, -inf }
  0xe3   :  { %v110_v13 = vsel %vm109_vm1, %v101_v11, -inf }
  0xe4   :  { %111 = vmax.xlane.f32.xlu0 %v110_v13 }
  0xe8   :  { %114 = vmax.xlane.f32.xlu0 %v113_v14 }
 0x171   :  { %v112_v15 = vpop.xlane.xlu0 %111 }
 0x172   :  { %v116_v16 = vsub.f32 %v101_v11, %v112_v15 }
 0x174   :  { %v118_v17 = vmul.f32 1.442695, %v116_v16 }
 0x175   :  { %v115_v18 = vpop.xlane.xlu0 %114 }
 0x176   :  { %168 = vpow2.f32 %v118_v17  ;;  %v117_v19 = vsub.f32 %v106_v12, %v115_v18 }
 0x178   :  { %v120_v20 = vmul.f32 1.442695, %v117_v19 }
 0x17a   :  { %170 = vpow2.f32 %v120_v20 }
 0x180   :  { %v169_v21 = vpop.eup %168 }
 0x181   :  { %v122_v22 = vsel %vm109_vm1, %v169_v21, 0.0 }
 0x182   :  { %123 = vadd.xlane.f32.xlu1 %v122_v22 }
 0x184   :  { %v171_v23 = vpop.eup %170 }
 0x185   :  { %v125_v24 = vsel %vm109_vm1, %v171_v23, 0.0 }
 0x186   :  { %126 = vadd.xlane.f32.xlu1 %v125_v24 }
 0x20f   :  { %v124_v25 = vpop.xlane.xlu1 %123 }
 0x210   :  { %172 = vlog2.f32 %v124_v25 }
 0x213   :  { %v127_v26 = vpop.xlane.xlu1 %126 }
 0x214   :  { %174 = vlog2.f32 %v127_v26 }
 0x21a   :  { %v173_v27 = vpop.eup %172 }
 0x21b   :  { %v129_v28 = vmul.f32 0.6931472, %v173_v27 }
 0x21d   :  { %v132_v29 = vsub.f32 %v116_v16, %v129_v28 }
 0x21e   :  { %v175_v30 = vpop.eup %174 }
 0x21f   :  { %134 = vst.msk [vmem:[%s232_s3] sm:$0xff] %vm109_vm1, %v132_v29  ;;  %v131_v31 = vmul.f32 0.6931472, %v175_v30 }
 0x221   :  { %v133_v32 = vsub.f32 %v117_v19, %v131_v31 }
 0x223   :  { %135 = vst.msk [vmem:[%s232_s3 + $0x8] sm:$0xff] %vm109_vm1, %v133_v32 }

</bundles_post_ra>
